<compile_context>
chip_gen: v7x
topology: tpu7x:2x2x1
jax: 0.10.0
libtpu: 0.0.40
codegen_flags: <defaults>
</compile_context>

<pallas_src>
import functools

import jax
import jax.numpy as jnp
from jax.experimental import pallas as pl
from jax.experimental.pallas import tpu as pltpu


_VMEM_LIMIT = 48 * 1024 * 1024        # explicit scoped-VMEM budget; v5e default is only
                                      # 16 MiB, v7x physical is 64 MiB.  Actual per-step
                                      # use of these kernels stays well under ~20 MiB.
_P_RESIDENT_BYTES = 8 * 1024 * 1024   # keep P_agg VMEM-resident below this (single copy;
                                      # double-buffered <= 16 MiB, safe on all gens).

# Measured fraction of the HBM roofline a streaming kernel reaches at a given tile edge
# (amortization of the ~0.35 us per-grid-step pipeline cost).
_EFF = {512: 0.85, 384: 0.78, 256: 0.63, 128: 0.29}


def _round_up(v, m):
    return ((v + m - 1) // m) * m


def _pad2(x, rows, cols):
    r, c = x.shape
    return jnp.pad(x, ((0, rows - r), (0, cols - c)))


def _pick_tiles(n):
    """Pick (n_pad, tm, tk) for the N x N aggregation matmul.

    The K tile fixes how much A must be padded, so choose it by minimizing
    padded-A bytes / streaming efficiency instead of rounding N up to lcm(tm, tk)
    (which inflates the dominant O(N^2) stream quadratically for awkward N).
    """
    def cost(t):
        n_t = _round_up(n, t)
        return (n_t * n_t) / _EFF[t]

    tk = min(_EFF, key=cost)
    n_pad = _round_up(n, tk)

    # Row tile: as large as possible (<= 512) while dividing n_pad, but prefer >= 2 row
    # tiles so the "parallel" axis still splits across both TensorCores on v7x.
    cands = [c for c in (512, 384, 256, 128) if n_pad % c == 0]
    tm = next((c for c in cands if n_pad // c >= 2), cands[-1])
    return n_pad, tm, tk


# ---------------------------------------------------------------------------
# Kernel 1: neighbor projection   P_agg = X @ W_l   (bf16, feeds the A matmul)
# ---------------------------------------------------------------------------
def _project_kernel(x_ref, w_ref, p_ref):
    p_ref[...] = jnp.dot(x_ref[...], w_ref[...],
                         preferred_element_type=jnp.float32).astype(p_ref.dtype)


# ---------------------------------------------------------------------------
# Kernel 2: tiled aggregation with fused root term
#   out = act( A @ P_agg  +  X @ W_r  +  b )
#   grid = (row tiles [parallel], A-col tiles [arbitrary]); f32 VMEM accumulator.
# ---------------------------------------------------------------------------
def _sage_agg_kernel(a_ref, p_agg_ref, x_ref, w_r_ref, b_ref, out_ref, acc_ref,
                     *, activation, nclass, tk, p_resident):
    k = pl.program_id(1)

    @pl.when(k == 0)
    def _():
        acc_ref[...] = jnp.zeros_like(acc_ref)

    if p_resident:
        # Whole P_agg lives in VMEM; slice the K chunk in-kernel (aligned to tk).
        koff = pl.multiple_of(k * tk, tk)
        p_blk = p_agg_ref[pl.ds(koff, tk), :]
    else:
        p_blk = p_agg_ref[...]
    acc_ref[...] += jnp.dot(a_ref[...], p_blk, preferred_element_type=jnp.float32)

    @pl.when(k == pl.num_programs(1) - 1)
    def _():
        # Fused root term: the (tm, f_in) X/h row tile and W_r are VMEM-resident across
        # the reduction axis, so this extra matmul hides under the A DMA stream.
        root = jnp.dot(x_ref[...], w_r_ref[...], preferred_element_type=jnp.float32)
        z = acc_ref[...] + root + b_ref[...]
        if activation == "relu":
            out_ref[...] = jnp.maximum(z, 0.0).astype(out_ref.dtype)
        else:  # masked log_softmax over the padded class lanes (f32 epilogue)
            lane = jax.lax.broadcasted_iota(jnp.int32, z.shape, 1)
            z = jnp.where(lane < nclass, z, -1e30)
            m = jnp.max(z, axis=1, keepdims=True)
            shifted = z - m
            lse = jnp.log(jnp.sum(jnp.exp(shifted), axis=1, keepdims=True))
            out_ref[...] = (shifted - lse).astype(out_ref.dtype)


def _sage_layer(a_bf, x_in, w_l, w_r, bias, *, out_dtype, activation, nclass=0,
                tm=128, tk=128, p_resident=True):
    """One SAGEConv layer: projection call + tiled aggregation call."""
    n_pad, f_in = x_in.shape
    f_out = w_l.shape[1]

    # Projection row tile: large enough to amortize the per-grid-step pipeline cost, but
    # keep the double-buffered X tile <= ~8 MiB so huge feature widths still fit VMEM.
    tp = next((c for c in (2048, 1536, 1024, 768, 512, 384, 256, 128)
               if n_pad % c == 0 and c * f_in * 4 <= 8 * 1024 * 1024), 128)

    # -- projection: contract the (small) feature dim before touching A ----------------
    p_agg = pl.pallas_call(
        _project_kernel,
        out_shape=jax.ShapeDtypeStruct((n_pad, f_out), jnp.bfloat16),
        grid_spec=pltpu.PrefetchScalarGridSpec(
            num_scalar_prefetch=0,
            grid=(n_pad // tp,),
            in_specs=[pl.BlockSpec((tp, f_in), lambda i: (i, 0)),
                      pl.BlockSpec((f_in, f_out), lambda i: (0, 0))],
            out_specs=pl.BlockSpec((tp, f_out), lambda i: (i, 0))),
        compiler_params=pltpu.CompilerParams(
            dimension_semantics=("parallel",),
            vmem_limit_bytes=_VMEM_LIMIT),
    )(x_in, w_l)

    # -- tiled mean-aggregation + fused root + bias + activation -----------------------
    kernel = functools.partial(_sage_agg_kernel, activation=activation,
                               nclass=nclass, tk=tk, p_resident=p_resident)
    if p_resident:
        # Constant block index -> DMA'd once, kept resident; no per-row-tile re-stream.
        p_spec = pl.BlockSpec((n_pad, f_out), lambda i, k: (0, 0))
    else:
        p_spec = pl.BlockSpec((tk, f_out), lambda i, k: (k, 0))

    return pl.pallas_call(
        kernel,
        out_shape=jax.ShapeDtypeStruct((n_pad, f_out), out_dtype),
        grid_spec=pltpu.PrefetchScalarGridSpec(
            num_scalar_prefetch=0,
            grid=(n_pad // tm, n_pad // tk),
            in_specs=[pl.BlockSpec((tm, tk), lambda i, k: (i, k)),       # A tile
                      p_spec,                                            # P_agg
                      pl.BlockSpec((tm, f_in), lambda i, k: (i, 0)),     # X/h row tile
                      pl.BlockSpec((f_in, f_out), lambda i, k: (0, 0)),  # W_r (resident)
                      pl.BlockSpec((1, f_out), lambda i, k: (0, 0))],    # bias (resident)
            out_specs=pl.BlockSpec((tm, f_out), lambda i, k: (i, 0)),
            scratch_shapes=[pltpu.VMEM((tm, f_out), jnp.float32)]),
        compiler_params=pltpu.CompilerParams(
            dimension_semantics=("parallel", "arbitrary"),
            vmem_limit_bytes=_VMEM_LIMIT),
    )(a_bf, p_agg, x_in, w_r, bias)


def graphsage_forward(a_mean, x, params, nclass):
    """Full 2-layer GraphSAGE forward.  Wrapper does padding / dtype plumbing only."""
    n, nfeat = x.shape
    nhid = params["w1l"].shape[1]

    f_pad = _round_up(nfeat, 128)
    h_pad = _round_up(nhid, 128)
    c_pad = _round_up(nclass, 128)
    n_pad, tm, tk = _pick_tiles(n)

    a_p = _pad2(a_mean, n_pad, n_pad).astype(jnp.bfloat16)
    x_p = _pad2(x, n_pad, f_pad).astype(jnp.bfloat16)

    # Weights stored [in, out]; zero-padding along the out axis keeps padded hidden
    # lanes exactly zero through relu (required for layer-2 correctness).
    w1l = _pad2(params["w1l"], f_pad, h_pad).astype(jnp.bfloat16)
    w1r = _pad2(params["w1r"], f_pad, h_pad).astype(jnp.bfloat16)
    b1 = _pad2(params["b1"], 1, h_pad).astype(jnp.float32)
    w2l = _pad2(params["w2l"], h_pad, c_pad).astype(jnp.bfloat16)
    w2r = _pad2(params["w2r"], h_pad, c_pad).astype(jnp.bfloat16)
    b2 = _pad2(params["b2"], 1, c_pad).astype(jnp.float32)

    def resident(f_out):
        return n_pad * f_out * 2 <= _P_RESIDENT_BYTES

    # Layer 1: SAGEConv(nfeat, nhid) + ReLU  (kept bf16 for the layer-2 MXU)
    h = _sage_layer(a_p, x_p, w1l, w1r, b1, out_dtype=jnp.bfloat16,
                    activation="relu", tm=tm, tk=tk, p_resident=resident(h_pad))
    # TODO(synk): F.dropout is identity at inference; training-mode dropout not implemented.

    # Layer 2: SAGEConv(nhid, nclass) + masked log_softmax over padded class lanes.
    z = _sage_layer(a_p, h, w2l, w2r, b2, out_dtype=jnp.float32,
                    activation="log_softmax", nclass=nclass, tm=tm, tk=tk,
                    p_resident=resident(c_pad))
    return z[:n, :nclass]


def build_mean_aggregation_matrix(edge_index, num_nodes):
    """Dense A with A[i, j] = 1/deg_in(i) for each edge (j -> i); zero rows for isolated
    nodes (matches PyG scatter-mean).  Plain-JAX glue."""
    src = edge_index[0]
    dst = edge_index[1]
    adj = jnp.zeros((num_nodes, num_nodes), jnp.float32).at[dst, src].add(1.0)
    deg = jnp.sum(adj, axis=1, keepdims=True)
    return jnp.where(deg > 0, adj / jnp.maximum(deg, 1.0), 0.0)


def init_params(key, nfeat, nhid, nclass):
    """Deterministic glorot-uniform init.  Weights stored as [in, out]."""
    def glorot(k, fan_in, fan_out):
        lim = jnp.sqrt(6.0 / (fan_in + fan_out))
        return jax.random.uniform(k, (fan_in, fan_out), jnp.float32, -lim, lim)

    k1, k2, k3, k4 = jax.random.split(key, 4)
    return {
        "w1l": glorot(k1, nfeat, nhid),
        "w1r": glorot(k2, nfeat, nhid),
        "b1": jnp.zeros((1, nhid), jnp.float32),
        "w2l": glorot(k3, nhid, nclass),
        "w2r": glorot(k4, nhid, nclass),
        "b2": jnp.zeros((1, nclass), jnp.float32),
    }


def _reference(a_mean, x, params, nclass):
    """Pure-JAX reference mirroring the kernel's mixed precision and matmul structure."""
    a = a_mean.astype(jnp.bfloat16)
    xb = x.astype(jnp.bfloat16)

    def layer(xin, wl, wr, b):
        p = jnp.dot(xin, wl.astype(jnp.bfloat16), preferred_element_type=jnp.float32)
        agg = jnp.dot(a, p.astype(jnp.bfloat16), preferred_element_type=jnp.float32)
        root = jnp.dot(xin, wr.astype(jnp.bfloat16), preferred_element_type=jnp.float32)
        return agg + root + b

    h = jnp.maximum(layer(xb, params["w1l"], params["w1r"], params["b1"]),
                    0.0).astype(jnp.bfloat16)
    z = layer(h, params["w2l"], params["w2r"], params["b2"])
    return jax.nn.log_softmax(z, axis=1)


if __name__ == "__main__":
    # 300 nodes (-> n_pad=384, row tiles of 128, one K tile), 16 feats, 32 hidden, 8 classes.
    N, NFEAT, NHID, NCLASS = 300, 16, 32, 8

    key = jax.random.PRNGKey(0)
    k_x, k_p = jax.random.split(key)

    x = jax.random.normal(k_x, (N, NFEAT), jnp.float32)

    # Deterministic graph: bidirectional ring + skip-7 chords (1200 directed edges).
    idx = jnp.arange(N, dtype=jnp.int32)
    src = jnp.concatenate([idx, (idx + 1) % N, idx, (idx + 7) % N])
    dst = jnp.concatenate([(idx + 1) % N, idx, (idx + 7) % N, idx])
    edge_index = jnp.stack([src, dst])

    a_mean = build_mean_aggregation_matrix(edge_index, N)
    params = init_params(k_p, NFEAT, NHID, NCLASS)

    out = graphsage_forward(a_mean, x, params, NCLASS)
    jax.block_until_ready(out)

    # Sanity: shape, softmax rows sum to ~1, matches mixed-precision reference.
    assert out.shape == (N, NCLASS)
    row_prob = jnp.sum(jnp.exp(out), axis=1)
    assert bool(jnp.all(jnp.abs(row_prob - 1.0) < 1e-4))
    ref = _reference(a_mean, x, params, NCLASS)
    assert bool(jnp.max(jnp.abs(out - ref)) < 5e-2)

    print("KERNEL_OK")
</pallas_src>

<mosaic_0001>
module attributes {stable_mosaic.version = 11 : i64} {
  func.func @_project_kernel(%arg0: i32, %arg1: memref<384x128xbf16, #tpu.memory_space<vmem>>, %arg2: memref<128x128xbf16, #tpu.memory_space<vmem>>, %arg3: memref<384x128xbf16, #tpu.memory_space<vmem>>) attributes {dimension_semantics = [#tpu.dimension_semantics<parallel>], iteration_bounds = array<i64: 1>, scalar_prefetch = 0 : i64, scratch_operands = 0 : i64, tpu.core_type = #tpu.core_type<tc>, window_params = [{transform_indices = @transform_0, window_bounds = array<i64: 384, 128>}, {pipeline_mode = #tpu.pipeline_mode<synchronous>, transform_indices = @transform_1, window_bounds = array<i64: 128, 128>}, {transform_indices = @transform_2, window_bounds = array<i64: 384, 128>}]} {
    %c0 = arith.constant 0 : index
    %c0_0 = arith.constant 0 : index
    %0 = vector.load %arg1[%c0, %c0_0] : memref<384x128xbf16, #tpu.memory_space<vmem>>, vector<384x128xbf16>
    %c0_1 = arith.constant 0 : index
    %c0_2 = arith.constant 0 : index
    %1 = vector.load %arg2[%c0_1, %c0_2] : memref<128x128xbf16, #tpu.memory_space<vmem>>, vector<128x128xbf16>
    %cst = arith.constant dense<0.000000e+00> : vector<384x128xf32>
    %2 = tpu.matmul %0, %1, %cst {dimension_numbers = #tpu.dot_dimension_numbers<[1], [0], [0], [1], [0, 0, 1, 1], [], []>} : vector<384x128xbf16>, vector<128x128xbf16>, vector<384x128xf32> -> vector<384x128xf32>
    %3 = arith.truncf %2 : vector<384x128xf32> to vector<384x128xbf16>
    %c0_3 = arith.constant 0 : index
    %c0_4 = arith.constant 0 : index
    %4 = vector.load %arg3[%c0_3, %c0_4] : memref<384x128xbf16, #tpu.memory_space<vmem>>, vector<384x128xbf16>
    tpu.vector_store %arg3[%c0_3, %c0_4], %3 {strides = array<i32>} : memref<384x128xbf16, #tpu.memory_space<vmem>>, vector<384x128xbf16>,
    return
  }
  func.func @transform_0(%arg0: i32) -> (i32, i32) {
    %c0_i32 = arith.constant 0 : i32
    %c0_i32_0 = arith.constant 0 : i32
    return %arg0, %c0_i32 : i32, i32
  }
  func.func @transform_1(%arg0: i32) -> (i32, i32) {
    %c0_i32 = arith.constant 0 : i32
    %c0_i32_0 = arith.constant 0 : i32
    %c0_i32_1 = arith.constant 0 : i32
    return %c0_i32, %c0_i32_0 : i32, i32
  }
  func.func @transform_2(%arg0: i32) -> (i32, i32) {
    %c0_i32 = arith.constant 0 : i32
    %c0_i32_0 = arith.constant 0 : i32
    return %arg0, %c0_i32 : i32, i32
  }
}

</mosaic_0001>

<bundles_post_ra>
// kernel: tpu_custom_call.1
= control target key start
LH: loop header
LB: loop body
LE: loop exit
PB: predicated region body
PF: predicated region fallthrough
CT: control target
= control target key end

     0   :  { %7 = vsyncpa [#allocation3], 0  ;;  %s1337_s0 = inlined_call_operand.hbm [shape: bf16[384,128], index: 0, kind: input, shape index: {}]   ;;  %s1338_s1 = inlined_call_operand.hbm [shape: bf16[128,128], index: 1, kind: input, shape index: {}]   ;;  %s1339_s2 = inlined_call_operand.hbm [shape: bf16[384,128], index: 2, kind: output, shape index: {}]  }
   0x1   :  { %8 = vsyncpa [#allocation6], 0 }
   0x2   :  { %9 = vsyncpa [#allocation4], 0  ;;  %s1272_s9 = smov [#allocation2]   ;;  %s1200_s13 = scalar_lea.hbm %s1337_s0, 3072 }
   0x3   :  { %s15_s10 = sshll.u32 %s1272_s9, 4  ;;  %p1201_p0 = scmp.ne.s32.totalorder %s1337_s0, %s1200_s13  ;;  %s16_s10 = int_to_ptr.vmem [resolvable:$true] %s15_s10 }
   0x4   :  { %p1204_p1 = scmp.lt.u32.totalorder %s1200_s13, %s1337_s0 }
   0x6   :  { %p1206_p2 = pnand %p1204_p1, %p1201_p0 }
   0x8   :  { %1209 = shalt.err (!%p1206_p2)
}
   0x9   :  { %s1210_s18 = scalar_lea.vmem %s16_s10, 3072  ;;  %p1215_p4 = scmp.lt.s32.totalorder %s16_s10, %s16_s10 }
   0xa   :  { %p1211_p3 = scmp.ne.s32.totalorder %s16_s10, %s1210_s18  ;;  %p1216_p5 = scmp.lt.s32.totalorder %s1210_s18, %s1210_s18 }
   0xc   :  { %p1217_p6 = por %p1216_p5, %p1215_p4 }
   0xe   :  { %p1218_p7 = pnand %p1217_p6, %p1211_p3 }
  0x10   :  { %1221 = shalt.err (!%p1218_p7)
}
  0x11   :  { %s1273_s19 = smov 64   ;;  %s1274_s20 = smov 4  }
  0x12   :  { %21 = dma.hbm_to_vmem [thread:$0]  %s1337_s0, 3072, %s16_s10, [#allocation3], %s1273_s19, %s1273_s19, %s1274_s20  }
  0x13   :  { %s1275_s23 = smov [#allocation5]   ;;  %s1222_s27 = scalar_lea.hbm %s1338_s1, 1024 }
  0x14   :  { %s27_s24 = sshll.u32 %s1275_s23, 4  ;;  %p1223_p8 = scmp.ne.s32.totalorder %s1338_s1, %s1222_s27  ;;  %s28_s24 = int_to_ptr.vmem [resolvable:$true] %s27_s24 }
  0x15   :  { %p1226_p9 = scmp.lt.u32.totalorder %s1222_s27, %s1338_s1 }
  0x17   :  { %p1228_p10 = pnand %p1226_p9, %p1223_p8 }
  0x19   :  { %1231 = shalt.err (!%p1228_p10)
}
  0x1a   :  { %s1232_s4 = scalar_lea.vmem %s28_s24, 1024  ;;  %p1237_p12 = scmp.lt.s32.totalorder %s28_s24, %s28_s24 }
  0x1b   :  { %p1233_p11 = scmp.ne.s32.totalorder %s28_s24, %s1232_s4  ;;  %p1238_p13 = scmp.lt.s32.totalorder %s1232_s4, %s1232_s4 }
  0x1d   :  { %p1239_p0 = por %p1238_p13, %p1237_p12 }
  0x1f   :  { %p1240_p1 = pnand %p1239_p0, %p1233_p11 }
  0x21   :  { %1243 = shalt.err (!%p1240_p1)
}
  0x22   :  { %33 = dma.hbm_to_vmem [thread:$0]  %s1338_s1, 1024, %s28_s24, [#allocation6], %s1273_s19, %s1273_s19, %s1274_s20  }
  0x23   :  { %1266 = dma.done.wait [#allocation3], 3072  }
  0x24   :  { %1267 = vsyncadd [#allocation3], 4294964224 }
  0x25   :  { %1268 = dma.done.wait [#allocation6], 1024  }
  0x26   :  { %1269 = vsyncadd [#allocation6], 4294966272  ;;  %v1168_v0 = vld [vmem:[#allocation5] sm:$0xff]   ;;  %v1169_v1 = vld [vmem:[#allocation5 + $0x8] sm:$0xff]   ;;  %s1276_s1 = smov [#allocation7]  }
  0x27   :  { %1083 = vmatprep.subr.bf16.mxu0 %v1168_v0  ;;  %1147 = vmatprep.subr.bf16.mxu1 %v1168_v0  ;;  %v1170_v2 = vld [vmem:[#allocation5 + $0x10] sm:$0xff]   ;;  %v1171_v3 = vld [vmem:[#allocation5 + $0x18] sm:$0xff]   ;;  %v1176_v4 = vld [vmem:[#allocation2] sm:$0xff]   ;;  %s767_s6 = sshll.u32 %s1276_s1, 4  ;;  %s768_s6 = int_to_ptr.vmem [resolvable:$true] %s767_s6 }
  0x28   :  { %1084 = vmatpush3.bf16.msra.mxu0 %v1168_v0  ;;  %1155 = vmatpush3.bf16.msra.mxu1 %v1168_v0  ;;  %v1177_v5 = vld [vmem:[#allocation2 + $0x60] sm:$0xff]   ;;  %v1173_v7 = vld [vmem:[#allocation5 + $0x28] sm:$0xff]   ;;  %v1174_v8 = vld [vmem:[#allocation5 + $0x30] sm:$0xff]   ;;  %s1244_s7 = scalar_lea.vmem %s768_s6, 3072  ;;  %p1249_p3 = scmp.lt.s32.totalorder %s768_s6, %s768_s6 }
  0x29   :  { %1085 = vmatprep.subr.bf16.mxu0 %v1169_v1  ;;  %1148 = vmatprep.subr.bf16.mxu1 %v1169_v1  ;;  %v1172_v6 = vld [vmem:[#allocation5 + $0x20] sm:$0xff]   ;;  %v1175_v9 = vld [vmem:[#allocation5 + $0x38] sm:$0xff]   ;;  %v1178_v10 = vld [vmem:[#allocation2 + $0x8] sm:$0xff]   ;;  %p1245_p2 = scmp.ne.s32.totalorder %s768_s6, %s1244_s7  ;;  %p1250_p4 = scmp.lt.s32.totalorder %s1244_s7, %s1244_s7 }
  0x2a   :  { %1099 = vmatprep.mubr.bf16.mxu0 %v1176_v4  ;;  %1123 = vmatprep.mubr.bf16.mxu1 %v1177_v5  ;;  %v1179_v11 = vld [vmem:[#allocation2 + $0x68] sm:$0xff]   ;;  %v1180_v12 = vld [vmem:[#allocation2 + $0x10] sm:$0xff]   ;;  %v1182_v14 = vld [vmem:[#allocation2 + $0x18] sm:$0xff]  }
  0x2b   :  { %v1181_v13 = vld [vmem:[#allocation2 + $0x70] sm:$0xff]   ;;  %v1183_v15 = vld [vmem:[#allocation2 + $0x78] sm:$0xff]   ;;  %v1184_v16 = vld [vmem:[#allocation2 + $0x20] sm:$0xff]   ;;  %p1251_p5 = por %p1250_p4, %p1249_p3 }
  0x2c   :  { %1086 = vmatpush3.bf16.msra.mxu0 %v1169_v1  ;;  %1156 = vmatpush3.bf16.msra.mxu1 %v1169_v1  ;;  %v1185_v17 = vld [vmem:[#allocation2 + $0x80] sm:$0xff]   ;;  %v1186_v18 = vld [vmem:[#allocation2 + $0x28] sm:$0xff]   ;;  %v1188_v20 = vld [vmem:[#allocation2 + $0x30] sm:$0xff]  }
  0x2d   :  { %1087 = vmatprep.subr.bf16.mxu0 %v1170_v2  ;;  %1149 = vmatprep.subr.bf16.mxu1 %v1170_v2  ;;  %v1187_v19 = vld [vmem:[#allocation2 + $0x88] sm:$0xff]   ;;  %v1189_v21 = vld [vmem:[#allocation2 + $0x90] sm:$0xff]   ;;  %v1190_v22 = vld [vmem:[#allocation2 + $0x38] sm:$0xff]   ;;  %p1252_p6 = pnand %p1251_p5, %p1245_p2 }
  0x2e   :  { %v1191_v23 = vld [vmem:[#allocation2 + $0x98] sm:$0xff]   ;;  %v1192_v24 = vld [vmem:[#allocation2 + $0x40] sm:$0xff]   ;;  %v1194_v26 = vld [vmem:[#allocation2 + $0x48] sm:$0xff]  }
  0x2f   :  { %v1193_v25 = vld [vmem:[#allocation2 + $0xa0] sm:$0xff]   ;;  %v1195_v27 = vld [vmem:[#allocation2 + $0xa8] sm:$0xff]   ;;  %v1196_v28 = vld [vmem:[#allocation2 + $0x50] sm:$0xff]  }
  0x30   :  { %1088 = vmatpush3.bf16.msra.mxu0 %v1170_v2  ;;  %1157 = vmatpush3.bf16.msra.mxu1 %v1170_v2  ;;  %v1197_v29 = vld [vmem:[#allocation2 + $0xb0] sm:$0xff]   ;;  %v1198_v30 = vld [vmem:[#allocation2 + $0x58] sm:$0xff]  }
  0x31   :  { %1089 = vmatprep.subr.bf16.mxu0 %v1171_v3  ;;  %1150 = vmatprep.subr.bf16.mxu1 %v1171_v3  ;;  %v1199_v31 = vld [vmem:[#allocation2 + $0xb8] sm:$0xff]  }
  0x34   :  { %1090 = vmatpush3.bf16.msra.mxu0 %v1171_v3  ;;  %1158 = vmatpush3.bf16.msra.mxu1 %v1171_v3 }
  0x35   :  { %1091 = vmatprep.subr.bf16.mxu0 %v1172_v6  ;;  %1151 = vmatprep.subr.bf16.mxu1 %v1172_v6 }
  0x38   :  { %1092 = vmatpush3.bf16.msra.mxu0 %v1172_v6  ;;  %1159 = vmatpush3.bf16.msra.mxu1 %v1172_v6 }
  0x39   :  { %1093 = vmatprep.subr.bf16.mxu0 %v1173_v7  ;;  %1152 = vmatprep.subr.bf16.mxu1 %v1173_v7 }
  0x3c   :  { %1094 = vmatpush3.bf16.msra.mxu0 %v1173_v7  ;;  %1160 = vmatpush3.bf16.msra.mxu1 %v1173_v7 }
  0x3d   :  { %1095 = vmatprep.subr.bf16.mxu0 %v1174_v8  ;;  %1153 = vmatprep.subr.bf16.mxu1 %v1174_v8 }
  0x40   :  { %1096 = vmatpush3.bf16.msra.mxu0 %v1174_v8  ;;  %1161 = vmatpush3.bf16.msra.mxu1 %v1174_v8 }
  0x41   :  { %1097 = vmatprep.subr.bf16.mxu0 %v1175_v9  ;;  %1154 = vmatprep.subr.bf16.mxu1 %v1175_v9 }
  0x44   :  { %1098 = vmatpush3.bf16.msra.mxu0 %v1175_v9  ;;  %1162 = vmatpush3.bf16.msra.mxu1 %v1175_v9 }
  0x47   :  { %1100 = vmatmul.mubr.bf16.vlgmr.msra.gmra.mrb[0].mxu0 %v1178_v10  ;;  %1124 = vmatmul.mubr.bf16.vlgmr.msra.gmra.mrb[0].mxu1 %v1179_v11 }
  0x48   :  { %1103 = vmatprep.mubr.bf16.mxu0 %v1180_v12  ;;  %1127 = vmatprep.mubr.bf16.mxu1 %v1181_v13 }
  0x4f   :  { %1104 = vmatmul.mubr.bf16.gmra.mrb[4].mxu0 %v1182_v14  ;;  %1128 = vmatmul.mubr.bf16.gmra.mrb[4].mxu1 %v1183_v15 }
  0x50   :  { %1107 = vmatprep.mubr.bf16.mxu0 %v1184_v16  ;;  %1131 = vmatprep.mubr.bf16.mxu1 %v1185_v17 }
  0x57   :  { %1108 = vmatmul.mubr.bf16.gmra.mrb[8].mxu0 %v1186_v18  ;;  %1132 = vmatmul.mubr.bf16.gmra.mrb[8].mxu1 %v1187_v19 }
  0x58   :  { %1111 = vmatprep.mubr.bf16.mxu0 %v1188_v20  ;;  %1135 = vmatprep.mubr.bf16.mxu1 %v1189_v21 }
  0x5f   :  { %1112 = vmatmul.mubr.bf16.gmra.mrb[12].mxu0 %v1190_v22  ;;  %1136 = vmatmul.mubr.bf16.gmra.mrb[12].mxu1 %v1191_v23 }
  0x60   :  { %1115 = vmatprep.mubr.bf16.mxu0 %v1192_v24  ;;  %1139 = vmatprep.mubr.bf16.mxu1 %v1193_v25 }
  0x67   :  { %1116 = vmatmul.mubr.bf16.gmra.mrb[16].mxu0 %v1194_v26  ;;  %1140 = vmatmul.mubr.bf16.gmra.mrb[16].mxu1 %v1195_v27 }
  0x68   :  { %1119 = vmatprep.mubr.bf16.mxu0 %v1196_v28  ;;  %1143 = vmatprep.mubr.bf16.mxu1 %v1197_v29 }
  0x6f   :  { %1120 = vmatmul.mubr.bf16.gmra.mrb[20].mxu0 %v1198_v30  ;;  %1144 = vmatmul.mubr.bf16.gmra.mrb[20].mxu1 %v1199_v31 }
 0x11a   :  { %v1101_v32 = vpop.f32.mrb[0].mxu0  ;;  %v1125_v33 = vpop.f32.mrb[0].mxu1 }
 0x11b   :  { %v331_v34 = vpop.f32.mrb[1].mxu0  ;;  %v427_v35 = vpop.f32.mrb[1].mxu1 }
 0x11c   :  { %v1102_v36 = vpop.f32.mrb[2].mxu0  ;;  %v1126_v37 = vpop.f32.mrb[2].mxu1 }
 0x11d   :  { %v916_v38 = vpack.c.bf16 %v1102_v36, %v1101_v32  ;;  %v976_v39 = vpack.c.bf16 %v1126_v37, %v1125_v33  ;;  %v334_v40 = vpop.f32.mrb[3].mxu0  ;;  %v430_v41 = vpop.f32.mrb[3].mxu1 }
 0x11e   :  { %v911_v42 = vpack.c.bf16 %v334_v40, %v331_v34  ;;  %v971_v43 = vpack.c.bf16 %v430_v41, %v427_v35 }
 0x11f   :  { %1028 = vst [vmem:[#allocation7 + $0x8] sm:$0xff] %v916_v38   ;;  %1040 = vst [vmem:[#allocation7 + $0x68] sm:$0xff] %v976_v39  }
 0x120   :  { %912 = vst [vmem:[#allocation7] sm:$0xff] %v911_v42   ;;  %1039 = vst [vmem:[#allocation7 + $0x60] sm:$0xff] %v971_v43  }
 0x122   :  { %v1105_v44 = vpop.f32.mrb[4].mxu0  ;;  %v1129_v45 = vpop.f32.mrb[4].mxu1 }
 0x123   :  { %v347_v46 = vpop.f32.mrb[5].mxu0  ;;  %v443_v47 = vpop.f32.mrb[5].mxu1 }
 0x124   :  { %v1106_v48 = vpop.f32.mrb[6].mxu0  ;;  %v1130_v49 = vpop.f32.mrb[6].mxu1 }
 0x125   :  { %v926_v50 = vpack.c.bf16 %v1106_v48, %v1105_v44  ;;  %v986_v51 = vpack.c.bf16 %v1130_v49, %v1129_v45  ;;  %v350_v52 = vpop.f32.mrb[7].mxu0  ;;  %v446_v53 = vpop.f32.mrb[7].mxu1 }
 0x126   :  { %v921_v54 = vpack.c.bf16 %v350_v52, %v347_v46  ;;  %v981_v55 = vpack.c.bf16 %v446_v53, %v443_v47 }
 0x127   :  { %1030 = vst [vmem:[#allocation7 + $0x18] sm:$0xff] %v926_v50   ;;  %1042 = vst [vmem:[#allocation7 + $0x78] sm:$0xff] %v986_v51  }
 0x128   :  { %1029 = vst [vmem:[#allocation7 + $0x10] sm:$0xff] %v921_v54   ;;  %1041 = vst [vmem:[#allocation7 + $0x70] sm:$0xff] %v981_v55  }
 0x12a   :  { %v1109_v56 = vpop.f32.mrb[8].mxu0  ;;  %v1133_v57 = vpop.f32.mrb[8].mxu1 }
 0x12b   :  { %v363_v58 = vpop.f32.mrb[9].mxu0  ;;  %v459_v59 = vpop.f32.mrb[9].mxu1 }
 0x12c   :  { %v1110_v60 = vpop.f32.mrb[10].mxu0  ;;  %v1134_v61 = vpop.f32.mrb[10].mxu1 }
 0x12d   :  { %v936_v62 = vpack.c.bf16 %v1110_v60, %v1109_v56  ;;  %v996_v63 = vpack.c.bf16 %v1134_v61, %v1133_v57  ;;  %v366_v0 = vpop.f32.mrb[11].mxu0  ;;  %v462_v1 = vpop.f32.mrb[11].mxu1 }
 0x12e   :  { %v931_v2 = vpack.c.bf16 %v366_v0, %v363_v58  ;;  %v991_v3 = vpack.c.bf16 %v462_v1, %v459_v59 }
 0x12f   :  { %1032 = vst [vmem:[#allocation7 + $0x28] sm:$0xff] %v936_v62   ;;  %1044 = vst [vmem:[#allocation7 + $0x88] sm:$0xff] %v996_v63  }
 0x130   :  { %1031 = vst [vmem:[#allocation7 + $0x20] sm:$0xff] %v931_v2   ;;  %1043 = vst [vmem:[#allocation7 + $0x80] sm:$0xff] %v991_v3  }
 0x132   :  { %v1113_v4 = vpop.f32.mrb[12].mxu0  ;;  %v1137_v5 = vpop.f32.mrb[12].mxu1 }
 0x133   :  { %v379_v6 = vpop.f32.mrb[13].mxu0  ;;  %v475_v7 = vpop.f32.mrb[13].mxu1 }
 0x134   :  { %v1114_v8 = vpop.f32.mrb[14].mxu0  ;;  %v1138_v9 = vpop.f32.mrb[14].mxu1 }
 0x135   :  { %v946_v10 = vpack.c.bf16 %v1114_v8, %v1113_v4  ;;  %v1006_v11 = vpack.c.bf16 %v1138_v9, %v1137_v5  ;;  %v382_v12 = vpop.f32.mrb[15].mxu0  ;;  %v478_v13 = vpop.f32.mrb[15].mxu1 }
 0x136   :  { %v941_v14 = vpack.c.bf16 %v382_v12, %v379_v6  ;;  %v1001_v15 = vpack.c.bf16 %v478_v13, %v475_v7 }
 0x137   :  { %1034 = vst [vmem:[#allocation7 + $0x38] sm:$0xff] %v946_v10   ;;  %1046 = vst [vmem:[#allocation7 + $0x98] sm:$0xff] %v1006_v11  }
 0x138   :  { %1033 = vst [vmem:[#allocation7 + $0x30] sm:$0xff] %v941_v14   ;;  %1045 = vst [vmem:[#allocation7 + $0x90] sm:$0xff] %v1001_v15  }
 0x13a   :  { %v1117_v16 = vpop.f32.mrb[16].mxu0  ;;  %v1141_v17 = vpop.f32.mrb[16].mxu1 }
 0x13b   :  { %v395_v18 = vpop.f32.mrb[17].mxu0  ;;  %v491_v19 = vpop.f32.mrb[17].mxu1 }
 0x13c   :  { %v1118_v20 = vpop.f32.mrb[18].mxu0  ;;  %v1142_v21 = vpop.f32.mrb[18].mxu1 }
 0x13d   :  { %v956_v22 = vpack.c.bf16 %v1118_v20, %v1117_v16  ;;  %v1016_v23 = vpack.c.bf16 %v1142_v21, %v1141_v17  ;;  %v398_v24 = vpop.f32.mrb[19].mxu0  ;;  %v494_v25 = vpop.f32.mrb[19].mxu1 }
 0x13e   :  { %v951_v26 = vpack.c.bf16 %v398_v24, %v395_v18  ;;  %v1011_v27 = vpack.c.bf16 %v494_v25, %v491_v19 }
 0x13f   :  { %1036 = vst [vmem:[#allocation7 + $0x48] sm:$0xff] %v956_v22   ;;  %1048 = vst [vmem:[#allocation7 + $0xa8] sm:$0xff] %v1016_v23  }
 0x140   :  { %1035 = vst [vmem:[#allocation7 + $0x40] sm:$0xff] %v951_v26   ;;  %1047 = vst [vmem:[#allocation7 + $0xa0] sm:$0xff] %v1011_v27  }
 0x142   :  { %v1121_v28 = vpop.f32.mrb[20].mxu0  ;;  %v1145_v29 = vpop.f32.mrb[20].mxu1 }
 0x143   :  { %v411_v30 = vpop.f32.mrb[21].mxu0  ;;  %v507_v31 = vpop.f32.mrb[21].mxu1 }
 0x144   :  { %v1122_v32 = vpop.f32.mrb[22].mxu0  ;;  %v1146_v33 = vpop.f32.mrb[22].mxu1 }
 0x145   :  { %v966_v34 = vpack.c.bf16 %v1122_v32, %v1121_v28  ;;  %v1026_v35 = vpack.c.bf16 %v1146_v33, %v1145_v29  ;;  %v414_v36 = vpop.f32.mrb[23].mxu0  ;;  %v510_v37 = vpop.f32.mrb[23].mxu1 }
 0x146   :  { %v961_v38 = vpack.c.bf16 %v414_v36, %v411_v30  ;;  %v1021_v39 = vpack.c.bf16 %v510_v37, %v507_v31 }
 0x147   :  { %1038 = vst [vmem:[#allocation7 + $0x58] sm:$0xff] %v966_v34   ;;  %1050 = vst [vmem:[#allocation7 + $0xb8] sm:$0xff] %v1026_v35  }
 0x148   :  { %1037 = vst [vmem:[#allocation7 + $0x50] sm:$0xff] %v961_v38   ;;  %1049 = vst [vmem:[#allocation7 + $0xb0] sm:$0xff] %v1021_v39  }
 0x149   :  { %1255 = shalt.err (!%p1252_p6)
}
 0x14a   :  { %s1256_s10 = scalar_lea.hbm %s1339_s2, 3072 }
 0x14b   :  { %p1257_p7 = scmp.ne.s32.totalorder %s1339_s2, %s1256_s10  ;;  %p1260_p8 = scmp.lt.u32.totalorder %s1256_s10, %s1339_s2 }
 0x14d   :  { %p1262_p9 = pnand %p1260_p8, %p1257_p7 }
 0x14f   :  { %1265 = shalt.err (!%p1262_p9)
}
 0x150   :  { %773 = dma.vmem_to_hbm [thread:$0]  %s768_s6, 3072, %s1339_s2, [#allocation4], %s1273_s19, %s1273_s19, %s1274_s20  }
 0x151   :  { %1270 = dma.done.wait [#allocation4], 3072  }
 0x152   :  { %1271 = vsyncadd [#allocation4], 4294964224 }
 0x153   :  { %777 = vsyncpa [#allocation3], 1 }
 0x154   :  { %778 = vsyncpa [#allocation6], 1 }
 0x155   :  { %779 = vsyncpa [#allocation4], 1 }

</bundles_post_ra>
